<compile_context>
chip_gen: v7x
topology: tpu7x:2x2x1
jax: 0.10.0
libtpu: 0.0.40
codegen_flags: <defaults>
</compile_context>

<pallas_src>
import functools

import jax
import jax.numpy as jnp
from jax.experimental import pallas as pl
from jax.experimental.pallas import tpu as pltpu


# ---------------------------------------------------------------------------
# Pallas kernel: fused Linear -> ReLU -> Linear -> ReLU -> Linear on one
# batch tile.  Weights are pre-transposed to (in_dim, out_dim).
# ---------------------------------------------------------------------------
def _doe_critic_kernel(x_ref, w1_ref, b1_ref, w2_ref, b2_ref, w3_ref, b3_ref,
                       out_ref, *, compute_dtype):
    # In-kernel cast (VPU has plenty of slack; avoids a wrapper-side HBM pass).
    x = x_ref[...].astype(compute_dtype)                     # (TB, D)

    # Layer 1: Linear + ReLU (f32 accumulation on the MXU).
    h1 = jnp.dot(x, w1_ref[...], preferred_element_type=jnp.float32)
    h1 = jnp.maximum(h1 + b1_ref[...], 0.0)                   # (TB, H1) f32

    # Layer 2: Linear + ReLU.
    h2 = jnp.dot(h1.astype(w2_ref.dtype), w2_ref[...],
                 preferred_element_type=jnp.float32)
    h2 = jnp.maximum(h2 + b2_ref[...], 0.0)                   # (TB, H2) f32

    # Output head: Linear (no activation), unpadded num_options lanes.
    q = jnp.dot(h2.astype(w3_ref.dtype), w3_ref[...],
                preferred_element_type=jnp.float32)
    out_ref[...] = (q + b3_ref[...]).astype(out_ref.dtype)    # (TB, K)


def _round_up(x, m):
    return ((x + m - 1) // m) * m


# ---------------------------------------------------------------------------
# Wrapper: batch tiling (no array padding), resident weights, bf16 compute.
# ---------------------------------------------------------------------------
def doe_critic_forward(obs, params, *, tile_b=4096,
                       compute_dtype=jnp.bfloat16,
                       out_dtype=None):
    """obs: (B, concat_dim).  params: dict of (in, out)-layout weights + biases."""
    B, D = obs.shape
    H1 = params["w1"].shape[1]
    H2 = params["w2"].shape[1]
    num_options = params["w3"].shape[1]
    out_dtype = obs.dtype if out_dtype is None else out_dtype

    # --- batch tile: 8-aligned, no jnp.pad of obs (partial last tile is
    # handled/masked by the Pallas pipeline) -------------------------------
    tb = min(tile_b, _round_up(B, 8))
    if B >= 16:
        # Ensure >=2 grid steps so ("parallel",) can shard across v7x's 2 TCs.
        tb = min(tb, _round_up(pl.cdiv(_round_up(B, 8), 2), 8))
    tb = max(8, (tb // 8) * 8)
    grid = (pl.cdiv(B, tb),)

    # --- dtype handling: tiny weights pre-cast to the compute dtype (cheap),
    # obs stays in its native dtype and is cast in-kernel; biases f32 -------
    cd = compute_dtype
    w1 = params["w1"].astype(cd)
    w2 = params["w2"].astype(cd)
    w3 = params["w3"].astype(cd)
    b1 = params["b1"].astype(jnp.float32)
    b2 = params["b2"].astype(jnp.float32)
    b3 = params["b3"].astype(jnp.float32)

    kernel = functools.partial(_doe_critic_kernel, compute_dtype=cd)

    out = pl.pallas_call(
        kernel,
        out_shape=jax.ShapeDtypeStruct((B, num_options), out_dtype),
        grid=grid,
        in_specs=[
            # obs: streamed per batch tile (auto double-buffered DMA).
            pl.BlockSpec((tb, D), lambda i: (i, 0)),
            # weights / biases: constant block index -> DMA'd once, resident.
            pl.BlockSpec((D, H1), lambda i: (0, 0)),
            pl.BlockSpec((1, H1), lambda i: (0, 0)),
            pl.BlockSpec((H1, H2), lambda i: (0, 0)),
            pl.BlockSpec((1, H2), lambda i: (0, 0)),
            pl.BlockSpec((H2, num_options), lambda i: (0, 0)),
            pl.BlockSpec((1, num_options), lambda i: (0, 0)),
        ],
        # Last dim == full array dim (num_options), so no (…,128) constraint.
        out_specs=pl.BlockSpec((tb, num_options), lambda i: (i, 0)),
        compiler_params=pltpu.CompilerParams(
            dimension_semantics=("parallel",),      # megacore-shard batch axis
            vmem_limit_bytes=32 * 1024 * 1024,      # safe on v5e/v6e/v7x, tb<=8192
        ),
    )(obs, w1, b1, w2, b2, w3, b3)

    return out


# ---------------------------------------------------------------------------
# Deterministic parameter init (shapes mirror the PyTorch module).
# Decoder: Linear(concat_dim->64), Linear(64->64); head: Linear(64->K).
# Orthogonal-ish init via QR; biases zero.  Weights stored pre-transposed.
# TODO(synk): PyTorch module overrides decoder weights with xavier_uniform_;
# init parity is not needed for forward-pass correctness.
# ---------------------------------------------------------------------------
def _orthogonal(key, shape, scale=1.0):
    n = max(shape)
    a = jax.random.normal(key, (n, n), dtype=jnp.float32)
    q, _ = jnp.linalg.qr(a)
    return (scale * q[: shape[0], : shape[1]]).astype(jnp.float32)


def init_params(key, concat_dim, num_options, hidden_units=(64, 64)):
    k1, k2, k3 = jax.random.split(key, 3)
    dims = (concat_dim,) + tuple(hidden_units)
    w1 = _orthogonal(k1, (dims[0], dims[1]))
    w2 = _orthogonal(k2, (dims[1], dims[2]))
    w3 = _orthogonal(k3, (dims[2], num_options))
    return {
        "w1": w1, "b1": jnp.zeros((1, dims[1]), jnp.float32),
        "w2": w2, "b2": jnp.zeros((1, dims[2]), jnp.float32),
        "w3": w3, "b3": jnp.zeros((1, num_options), jnp.float32),
    }


# Pure-JAX reference of the PyTorch forward (mirrors kernel dtype handling).
def reference_forward(obs, p, compute_dtype=jnp.float32):
    cd = compute_dtype

    def lin(x, w, b):
        return jnp.dot(x.astype(cd), w.astype(cd),
                       preferred_element_type=jnp.float32) + b

    h = jnp.maximum(lin(obs, p["w1"], p["b1"]), 0.0)
    h = jnp.maximum(lin(h, p["w2"], p["b2"]), 0.0)
    return lin(h, p["w3"], p["b3"])


if __name__ == "__main__":
    key = jax.random.PRNGKey(0)
    k_obs, k_obs2, k_par = jax.random.split(key, 3)

    concat_dim = 32
    num_options = 8
    hidden_units = (64, 64)
    params = init_params(k_par, concat_dim, num_options, hidden_units)

    fwd = jax.jit(doe_critic_forward,
                  static_argnames=("tile_b", "compute_dtype", "out_dtype"))

    # --- check 1: small batch, single grid step, f32 compute ----------------
    batch = 8
    obs = jax.random.normal(k_obs, (batch, concat_dim), dtype=jnp.float32)
    q = jax.block_until_ready(fwd(obs, params, compute_dtype=jnp.float32))
    q_ref = reference_forward(obs, params)
    assert q.shape == (batch, num_options)
    assert jnp.allclose(q, q_ref, atol=1e-4, rtol=1e-4), "f32 mismatch"

    # --- check 2: batch not a tile multiple (masked partial last tile), f32 -
    batch2 = 138
    obs2 = jax.random.normal(k_obs2, (batch2, concat_dim), dtype=jnp.float32)
    q2 = jax.block_until_ready(
        fwd(obs2, params, tile_b=64, compute_dtype=jnp.float32))
    q2_ref = reference_forward(obs2, params)
    assert q2.shape == (batch2, num_options)
    assert jnp.allclose(q2, q2_ref, atol=1e-4, rtol=1e-4), "tiled f32 mismatch"

    # --- check 3: default bf16 MXU operands, f32 accumulation ---------------
    q_bf = jax.block_until_ready(fwd(obs, params))
    q_bf_ref = reference_forward(obs, params, compute_dtype=jnp.bfloat16)
    assert jnp.allclose(q_bf, q_bf_ref, atol=2e-2, rtol=2e-2), "bf16 mismatch"

    print("KERNEL_OK")
</pallas_src>

<mosaic_0001>
module attributes {stable_mosaic.version = 11 : i64} {
  func.func @_doe_critic_kernel(%arg0: i32, %arg1: memref<8x32xf32, #tpu.memory_space<vmem>>, %arg2: memref<32x64xf32, #tpu.memory_space<vmem>>, %arg3: memref<1x64xf32, #tpu.memory_space<vmem>>, %arg4: memref<64x64xf32, #tpu.memory_space<vmem>>, %arg5: memref<1x64xf32, #tpu.memory_space<vmem>>, %arg6: memref<64x8xf32, #tpu.memory_space<vmem>>, %arg7: memref<1x8xf32, #tpu.memory_space<vmem>>, %arg8: memref<8x8xf32, #tpu.memory_space<vmem>>) attributes {dimension_semantics = [#tpu.dimension_semantics<parallel>], iteration_bounds = array<i64: 1>, scalar_prefetch = 0 : i64, scratch_operands = 0 : i64, tpu.core_type = #tpu.core_type<tc>, window_params = [{transform_indices = @transform_0, window_bounds = array<i64: 8, 32>}, {pipeline_mode = #tpu.pipeline_mode<synchronous>, transform_indices = @transform_1, window_bounds = array<i64: 32, 64>}, {pipeline_mode = #tpu.pipeline_mode<synchronous>, transform_indices = @transform_2, window_bounds = array<i64: 1, 64>}, {pipeline_mode = #tpu.pipeline_mode<synchronous>, transform_indices = @transform_3, window_bounds = array<i64: 64, 64>}, {pipeline_mode = #tpu.pipeline_mode<synchronous>, transform_indices = @transform_4, window_bounds = array<i64: 1, 64>}, {pipeline_mode = #tpu.pipeline_mode<synchronous>, transform_indices = @transform_5, window_bounds = array<i64: 64, 8>}, {pipeline_mode = #tpu.pipeline_mode<synchronous>, transform_indices = @transform_6, window_bounds = array<i64: 1, 8>}, {transform_indices = @transform_7, window_bounds = array<i64: 8, 8>}]} {
    %c0 = arith.constant 0 : index
    %c0_0 = arith.constant 0 : index
    %0 = vector.load %arg1[%c0, %c0_0] : memref<8x32xf32, #tpu.memory_space<vmem>>, vector<8x32xf32>
    %c0_1 = arith.constant 0 : index
    %c0_2 = arith.constant 0 : index
    %1 = vector.load %arg2[%c0_1, %c0_2] : memref<32x64xf32, #tpu.memory_space<vmem>>, vector<32x64xf32>
    %cst = arith.constant dense<0.000000e+00> : vector<8x64xf32>
    %2 = tpu.matmul %0, %1, %cst {dimension_numbers = #tpu.dot_dimension_numbers<[1], [0], [0], [1], [0, 0, 1, 1], [], []>} : vector<8x32xf32>, vector<32x64xf32>, vector<8x64xf32> -> vector<8x64xf32>
    %c0_3 = arith.constant 0 : index
    %c0_4 = arith.constant 0 : index
    %3 = vector.load %arg3[%c0_3, %c0_4] : memref<1x64xf32, #tpu.memory_space<vmem>>, vector<1x64xf32>
    %4 = vector.broadcast %3 : vector<1x64xf32> to vector<8x64xf32>
    %5 = arith.addf %2, %4 : vector<8x64xf32>
    %cst_5 = arith.constant 0.000000e+00 : f32
    %6 = vector.broadcast %cst_5 : f32 to vector<8x64xf32>
    %7 = arith.maximumf %5, %6 : vector<8x64xf32>
    %c0_6 = arith.constant 0 : index
    %c0_7 = arith.constant 0 : index
    %8 = vector.load %arg4[%c0_6, %c0_7] : memref<64x64xf32, #tpu.memory_space<vmem>>, vector<64x64xf32>
    %cst_8 = arith.constant dense<0.000000e+00> : vector<8x64xf32>
    %9 = tpu.matmul %7, %8, %cst_8 {dimension_numbers = #tpu.dot_dimension_numbers<[1], [0], [0], [1], [0, 0, 1, 1], [], []>} : vector<8x64xf32>, vector<64x64xf32>, vector<8x64xf32> -> vector<8x64xf32>
    %c0_9 = arith.constant 0 : index
    %c0_10 = arith.constant 0 : index
    %10 = vector.load %arg5[%c0_9, %c0_10] : memref<1x64xf32, #tpu.memory_space<vmem>>, vector<1x64xf32>
    %11 = vector.broadcast %10 : vector<1x64xf32> to vector<8x64xf32>
    %12 = arith.addf %9, %11 : vector<8x64xf32>
    %cst_11 = arith.constant 0.000000e+00 : f32
    %13 = vector.broadcast %cst_11 : f32 to vector<8x64xf32>
    %14 = arith.maximumf %12, %13 : vector<8x64xf32>
    %c0_12 = arith.constant 0 : index
    %c0_13 = arith.constant 0 : index
    %15 = vector.load %arg6[%c0_12, %c0_13] : memref<64x8xf32, #tpu.memory_space<vmem>>, vector<64x8xf32>
    %cst_14 = arith.constant dense<0.000000e+00> : vector<8x8xf32>
    %16 = tpu.matmul %14, %15, %cst_14 {dimension_numbers = #tpu.dot_dimension_numbers<[1], [0], [0], [1], [0, 0, 1, 1], [], []>} : vector<8x64xf32>, vector<64x8xf32>, vector<8x8xf32> -> vector<8x8xf32>
    %c0_15 = arith.constant 0 : index
    %c0_16 = arith.constant 0 : index
    %17 = vector.load %arg7[%c0_15, %c0_16] : memref<1x8xf32, #tpu.memory_space<vmem>>, vector<1x8xf32>
    %18 = vector.broadcast %17 : vector<1x8xf32> to vector<8x8xf32>
    %19 = arith.addf %16, %18 : vector<8x8xf32>
    %c0_17 = arith.constant 0 : index
    %c0_18 = arith.constant 0 : index
    %20 = vector.load %arg8[%c0_17, %c0_18] : memref<8x8xf32, #tpu.memory_space<vmem>>, vector<8x8xf32>
    tpu.vector_store %arg8[%c0_17, %c0_18], %19 {strides = array<i32>} : memref<8x8xf32, #tpu.memory_space<vmem>>, vector<8x8xf32>,
    return
  }
  func.func @transform_0(%arg0: i32) -> (i32, i32) {
    %c0_i32 = arith.constant 0 : i32
    %c0_i32_0 = arith.constant 0 : i32
    return %arg0, %c0_i32 : i32, i32
  }
  func.func @transform_1(%arg0: i32) -> (i32, i32) {
    %c0_i32 = arith.constant 0 : i32
    %c0_i32_0 = arith.constant 0 : i32
    %c0_i32_1 = arith.constant 0 : i32
    return %c0_i32, %c0_i32_0 : i32, i32
  }
  func.func @transform_2(%arg0: i32) -> (i32, i32) {
    %c0_i32 = arith.constant 0 : i32
    %c0_i32_0 = arith.constant 0 : i32
    %c0_i32_1 = arith.constant 0 : i32
    return %c0_i32, %c0_i32_0 : i32, i32
  }
  func.func @transform_3(%arg0: i32) -> (i32, i32) {
    %c0_i32 = arith.constant 0 : i32
    %c0_i32_0 = arith.constant 0 : i32
    %c0_i32_1 = arith.constant 0 : i32
    return %c0_i32, %c0_i32_0 : i32, i32
  }
  func.func @transform_4(%arg0: i32) -> (i32, i32) {
    %c0_i32 = arith.constant 0 : i32
    %c0_i32_0 = arith.constant 0 : i32
    %c0_i32_1 = arith.constant 0 : i32
    return %c0_i32, %c0_i32_0 : i32, i32
  }
  func.func @transform_5(%arg0: i32) -> (i32, i32) {
    %c0_i32 = arith.constant 0 : i32
    %c0_i32_0 = arith.constant 0 : i32
    %c0_i32_1 = arith.constant 0 : i32
    return %c0_i32, %c0_i32_0 : i32, i32
  }
  func.func @transform_6(%arg0: i32) -> (i32, i32) {
    %c0_i32 = arith.constant 0 : i32
    %c0_i32_0 = arith.constant 0 : i32
    %c0_i32_1 = arith.constant 0 : i32
    return %c0_i32, %c0_i32_0 : i32, i32
  }
  func.func @transform_7(%arg0: i32) -> (i32, i32) {
    %c0_i32 = arith.constant 0 : i32
    %c0_i32_0 = arith.constant 0 : i32
    return %arg0, %c0_i32 : i32, i32
  }
}

</mosaic_0001>

<bundles_post_ra>
// kernel: doe_critic_forward.1
= control target key start
LH: loop header
LB: loop body
LE: loop exit
PB: predicated region body
PF: predicated region fallthrough
CT: control target
= control target key end

     0   :  { %12 = vsyncpa [#allocation3], 0  ;;  %s620_s0 = inlined_call_operand.vmem [shape: f32[8,32], index: 0, kind: input, shape index: {}]   ;;  %s621_s1 = inlined_call_operand.hbm [shape: f32[32,64], index: 1, kind: input, shape index: {}]   ;;  %s622_s2 = inlined_call_operand.vmem [shape: f32[1,64], index: 2, kind: input, shape index: {}]   ;;  %s623_s3 = inlined_call_operand.vmem [shape: f32[64,64], index: 3, kind: input, shape index: {}]   ;;  %s624_s4 = inlined_call_operand.vmem [shape: f32[1,64], index: 4, kind: input, shape index: {}]   ;;  %s625_s5 = inlined_call_operand.vmem [shape: f32[64,8], index: 5, kind: input, shape index: {}]   ;;  %s626_s6 = inlined_call_operand.vmem [shape: f32[1,8], index: 6, kind: input, shape index: {}]   ;;  %s627_s7 = inlined_call_operand.hbm [shape: f32[8,8], index: 7, kind: output, shape index: {}]  }
   0x1   :  { %13 = vsyncpa [#allocation4], 0  ;;  %s486_s24 = smov [#allocation2]   ;;  %s438_s28 = scalar_lea.hbm %s621_s1, 512 }
   0x2   :  { %s21_s25 = sshll.u32 %s486_s24, 4  ;;  %p439_p0 = scmp.ne.s32.totalorder %s621_s1, %s438_s28  ;;  %s22_s25 = int_to_ptr.vmem [resolvable:$true] %s21_s25 }
   0x3   :  { %p442_p1 = scmp.lt.u32.totalorder %s438_s28, %s621_s1 }
   0x5   :  { %p444_p2 = pnand %p442_p1, %p439_p0 }
   0x7   :  { %447 = shalt.err (!%p444_p2)
}
   0x8   :  { %s448_s10 = scalar_lea.vmem %s22_s25, 512  ;;  %p453_p4 = scmp.lt.s32.totalorder %s22_s25, %s22_s25 }
   0x9   :  { %p449_p3 = scmp.ne.s32.totalorder %s22_s25, %s448_s10  ;;  %p454_p5 = scmp.lt.s32.totalorder %s448_s10, %s448_s10 }
   0xb   :  { %p455_p6 = por %p454_p5, %p453_p4 }
   0xd   :  { %p456_p7 = pnand %p455_p6, %p449_p3 }
   0xf   :  { %459 = shalt.err (!%p456_p7)
}
  0x10   :  { %s487_s11 = smov 128   ;;  %s488_s12 = smov 8  }
  0x11   :  { %27 = dma.hbm_to_vmem [thread:$0]  %s621_s1, 512, %s22_s25, [#allocation3], %s487_s11, %s487_s11, %s488_s12  }
  0x12   :  { %482 = dma.done.wait [#allocation3], 512  }
  0x13   :  { %483 = vsyncadd [#allocation3], 4294966784  ;;  %v489_v0 = vmov 0.0|0.0   ;;  %vm490_vm0 = vmmov 0   ;;  %v491_v1 = vmov 0.0   ;;  %v42_v2 = vld [vmem:[#allocation2] sm:$0xff] }
  0x14   :  { %401 = vmatprep.subr.bf16.mxu0 %v489_v0  ;;  %360 = vmatprep.mubr.msk.f32.mxu0 %vm490_vm0, %v491_v1  ;;  %v43_v3 = vld [vmem:[#allocation2 + $0x8] sm:$0xff]  ;;  %v44_v4 = vld [vmem:[#allocation2 + $0x10] sm:$0xff]  ;;  %v45_v6 = vld [vmem:[#allocation2 + $0x18] sm:$0xff]  ;;  %vm53_vm1 = vcmask 261120   ;;  %vm143_vm2 = vcmask 523264   ;;  %s492_s27 = smov [#allocation5]  }
  0x15   :  { %407 = vmatprep.subr.bf16.mxu1 %v489_v0  ;;  %379 = vmatprep.mubr.msk.f32.mxu1 %vm490_vm0, %v491_v1  ;;  %v402_v5 = vpack.c.bf16 %v43_v3, %v42_v2  ;;  %v128_v7 = vld [vmem:[%s623_s3] sm:$0xff]  ;;  %v129_v8 = vld [vmem:[%s623_s3 + $0x8] sm:$0xff]  ;;  %v130_v9 = vld [vmem:[%s623_s3 + $0x10] sm:$0xff]  ;;  %v405_v11 = vpack.c.bf16 %v45_v6, %v44_v4  ;;  %s314_s28 = sshll.u32 %s492_s27, 4  ;;  %vm306_vm3 = vcmask 64512   ;;  %s315_s28 = int_to_ptr.vmem [resolvable:$true] %s314_s28 }
  0x16   :  { %v131_v10 = vld [vmem:[%s623_s3 + $0x18] sm:$0xff]  ;;  %v408_v12 = vpack.c.bf16 %v129_v8, %v128_v7  ;;  %v132_v14 = vld [vmem:[%s623_s3 + $0x20] sm:$0xff]  ;;  %v133_v15 = vld [vmem:[%s623_s3 + $0x28] sm:$0xff]  ;;  %p465_p9 = scmp.lt.s32.totalorder %s315_s28, %s315_s28 }
  0x17   :  { %403 = vmatpush3.bf16.msra.mxu0 %v402_v5  ;;  %v411_v13 = vpack.c.bf16 %v131_v10, %v130_v9  ;;  %v41_v16 = vld [vmem:[%s620_s0] sm:$0xff]  ;;  %v414_v17 = vpack.c.bf16 %v133_v15, %v132_v14  ;;  %v134_v18 = vld [vmem:[%s623_s3 + $0x30] sm:$0xff]  ;;  %v135_v19 = vld [vmem:[%s623_s3 + $0x38] sm:$0xff] }
  0x18   :  { %404 = vmatprep.subr.bf16.mxu0 %v489_v0  ;;  %409 = vmatpush3.bf16.msra.mxu1 %v408_v12  ;;  %v417_v20 = vpack.c.bf16 %v135_v19, %v134_v18  ;;  %v218_v21 = vld [vmem:[%s625_s5] sm:$0xff]  ;;  %v219_v22 = vld [vmem:[%s625_s5 + $0x8] sm:$0xff]  ;;  %v220_v23 = vld [vmem:[%s625_s5 + $0x10] sm:$0xff] }
  0x19   :  { %410 = vmatprep.subr.bf16.mxu1 %v489_v0  ;;  %v420_v24 = vpack.c.bf16 %v219_v22, %v218_v21  ;;  %v221_v25 = vld [vmem:[%s625_s5 + $0x18] sm:$0xff]  ;;  %v222_v27 = vld [vmem:[%s625_s5 + $0x20] sm:$0xff]  ;;  %v223_v28 = vld [vmem:[%s625_s5 + $0x28] sm:$0xff] }
  0x1a   :  { %v423_v26 = vpack.c.bf16 %v221_v25, %v220_v23  ;;  %v426_v29 = vpack.c.bf16 %v223_v28, %v222_v27  ;;  %v323_v30 = vld [vmem:[%s622_s2] ss:$0 sm:$0xff]  ;;  %v224_v35 = vld [vmem:[%s625_s5 + $0x30] sm:$0xff]  ;;  %v225_v36 = vld [vmem:[%s625_s5 + $0x38] sm:$0xff]  ;;  %s460_s5 = scalar_lea.vmem %s315_s28, 128 }
  0x1b   :  { %406 = vmatpush3.bf16.msra.mxu0 %v405_v11  ;;  %v429_v37 = vpack.c.bf16 %v225_v36, %v224_v35  ;;  %v325_v38 = vld [vmem:[%s624_s4] ss:$0 sm:$0xff]  ;;  %p461_p8 = scmp.ne.s32.totalorder %s315_s28, %s460_s5  ;;  %p466_p10 = scmp.lt.s32.totalorder %s460_s5, %s460_s5 }
  0x1c   :  { %419 = vmatprep.subr.bf16.mxu0 %v489_v0  ;;  %412 = vmatpush3.bf16.msra.mxu1 %v411_v13  ;;  %v327_v43 = vld [vmem:[%s626_s6] ss:$0 sm:$0xff] }
  0x1d   :  { %413 = vmatprep.subr.bf16.mxu1 %v489_v0  ;;  %p467_p11 = por %p466_p10, %p465_p9 }
  0x1e   :  { %361 = vmatmul.mubr.msk.f32.vlgmr.msra.gmra.mrb[0].mxu0 %vm53_vm1, %v41_v16 }
  0x1f   :  { %398 = vmatprep.mubr.msk.f32.mxu0 %vm490_vm0, %v491_v1  ;;  %421 = vmatpush3.bf16.msra.mxu0 %v420_v24  ;;  %p468_p12 = pnand %p467_p11, %p461_p8 }
  0x20   :  { %415 = vmatpush3.bf16.msra.mxu1 %v414_v17  ;;  %422 = vmatprep.subr.bf16.mxu0 %v489_v0 }
  0x21   :  { %416 = vmatprep.subr.bf16.mxu1 %v489_v0 }
  0x23   :  { %424 = vmatpush3.bf16.msra.mxu0 %v423_v26 }
  0x24   :  { %418 = vmatpush3.bf16.msra.mxu1 %v417_v20  ;;  %425 = vmatprep.subr.bf16.mxu0 %v489_v0 }
  0x27   :  { %427 = vmatpush3.bf16.msra.mxu0 %v426_v29 }
  0x28   :  { %428 = vmatprep.subr.bf16.mxu0 %v489_v0 }
  0x2b   :  { %430 = vmatpush3.bf16.msra.mxu0 %v429_v37 }
  0xf1   :  { %v123_v31 = vpop.f32.mrb[0].mxu0 }
  0xf2   :  { %v124_v32 = vadd.f32 %v323_v30, %v123_v31  ;;  %v362_v33 = vpop.f32.mrb[1].mxu0 }
  0xf4   :  { %v127_v34 = vmax.f32 %v124_v32, 0.0 }
  0xf6   :  { %380 = vmatmul.mubr.msk.f32.vlgmr.msra.gmra.mrb[0].mxu1 %vm143_vm2, %v127_v34 }
 0x1c9   :  { %v213_v39 = vpop.f32.mrb[0].mxu1 }
 0x1ca   :  { %v214_v40 = vadd.f32 %v325_v38, %v213_v39  ;;  %v381_v41 = vpop.f32.mrb[1].mxu1 }
 0x1cc   :  { %v217_v42 = vmax.f32 %v214_v40, 0.0 }
 0x1ce   :  { %399 = vmatmul.mubr.msk.f32.vlgmr.msra.gmra.mrb[2].mxu0 %vm143_vm2, %v217_v42 }
 0x2a1   :  { %v302_v44 = vpop.f32.mrb[2].mxu0 }
 0x2a2   :  { %v303_v45 = vadd.f32 %v327_v43, %v302_v44  ;;  %v400_v46 = vpop.f32.mrb[3].mxu0 }
 0x2a4   :  { %307 = vst.msk [vmem:[#allocation5] sm:$0xff] %vm306_vm3, %v303_v45 }
 0x2a5   :  { %471 = shalt.err (!%p468_p12)
}
 0x2a6   :  { %s472_s30 = scalar_lea.hbm %s627_s7, 128 }
 0x2a7   :  { %p473_p13 = scmp.ne.s32.totalorder %s627_s7, %s472_s30  ;;  %p476_p0 = scmp.lt.u32.totalorder %s472_s30, %s627_s7 }
 0x2a9   :  { %p478_p1 = pnand %p476_p0, %p473_p13 }
 0x2ab   :  { %481 = shalt.err (!%p478_p1)
}
 0x2ac   :  { %317 = dma.vmem_to_hbm [thread:$0]  %s315_s28, 128, %s627_s7, [#allocation4]  }
 0x2ad   :  { %484 = dma.done.wait [#allocation4], 128  }
 0x2ae   :  { %485 = vsyncadd [#allocation4], 4294967168 }
 0x2af   :  { %321 = vsyncpa [#allocation3], 1 }
 0x2b0   :  { %322 = vsyncpa [#allocation4], 1 }

</bundles_post_ra>
